<compile_context>
chip_gen: v5e
topology: v5e:2x2
jax: 0.10.0
libtpu: 0.0.40
codegen_flags: <defaults>
</compile_context>

<pallas_src>
import functools

import jax
import jax.numpy as jnp
from jax.experimental import pallas as pl
from jax.experimental.pallas import tpu as pltpu


def _round_up(n, m):
    return ((n + m - 1) // m) * m


def _vmem_budget():
    """Generation-aware (budget, scoped-limit cap) in bytes."""
    cap = 64 * 2**20                       # conservative default (v7x class)
    try:
        info = pltpu.get_tpu_info()
        cap = int(getattr(info, "vmem_capacity_bytes", cap)) or cap
    except Exception:
        pass
    if cap >= 128 * 2**20:                 # v5e / v6e: 128 MiB per TensorCore
        return 96 * 2**20, 100 * 2**20
    return 40 * 2**20, 48 * 2**20          # v7x: 64 MiB per TensorCore


def _causal_conv1d_kernel(x_ref, w_ref, b_ref, o_ref, *scratch, kernel_size,
                          dilation, causal_pad, halo_lanes):
    """One (batch, time-tile) grid step.

    x_ref:   (1, C_in, TT)    current time tile (time on lanes).
    w_ref:   (K, C_out, C_in) weights (resident across the grid).
    b_ref:   (C_out, 1)       f32 bias.
    o_ref:   (1, C_out, TT)   output tile (lane-dense stores).
    scratch: iff causal_pad > 0, a (C_in, halo_lanes + TT) VMEM window carrying
             the causal left context across time tiles.
    """
    tt = x_ref.shape[-1]
    c_in = x_ref.shape[-2]
    x_tile = x_ref[0]                                   # (C_in, TT)

    win = None
    if causal_pad > 0:
        win_ref = scratch[0]                            # (C_in, halo_lanes + TT)
        width = halo_lanes + tt

        @pl.when(pl.program_id(1) == 0)
        def _zero_halo():                               # t < 0 is zero (causal pad)
            win_ref[:, 0:halo_lanes] = jnp.zeros((c_in, halo_lanes),
                                                 win_ref.dtype)

        # Append the current tile after the carried halo (128-aligned offsets).
        win_ref[:, halo_lanes:] = x_tile
        win = win_ref[...]                              # (C_in, halo_lanes + TT)

    # K accumulating MXU dots; tap k reads x shifted right by (K-1-k)*dilation.
    acc = None
    for k in range(kernel_size):
        shift = (kernel_size - 1 - k) * dilation
        if shift == 0 or causal_pad == 0:
            xk = x_tile                                 # bulk read straight from x_ref
        else:
            # xk[:, t] = win[:, halo_lanes - shift + t]; realized as a lane
            # rotation (XLU) followed by an aligned leading slice.
            r = (tt + shift) % width
            rolled = pltpu.roll(win, shift=r, axis=1) if r != 0 else win
            xk = rolled[:, 0:tt]
        d = jnp.dot(w_ref[k], xk, preferred_element_type=jnp.float32)
        acc = d if acc is None else acc + d

    acc = acc + b_ref[...].astype(jnp.float32)          # broadcast over lanes
    o_ref[0] = acc.astype(o_ref.dtype)

    if causal_pad > 0:
        # Carry the last halo_lanes samples for the next time tile (aligned
        # block copy; TT >= halo_lanes so source and dest do not overlap).
        tail = win_ref[:, tt:tt + halo_lanes]
        win_ref[:, 0:halo_lanes] = tail


def causal_conv1d(x, weight, bias, dilation=1, *, time_tile=2048,
                  compute_dtype=jnp.bfloat16):
    """Dilated causal conv1d matching PyTorch CausalConv1d.forward.

    Args:
      x:        (B, C_in, T).
      weight:   (C_out, C_in, K)  (PyTorch Conv1d layout).
      bias:     (C_out,) or None.
      dilation: int.
      time_tile: target time-tile length (rounded to a multiple of 128 and
        auto-sized against the per-generation VMEM budget / halo).
      compute_dtype: MXU feed dtype (default bfloat16; accumulation is f32 and
        the output keeps x.dtype).  Use jnp.float32 for strict tolerances.

    Returns:
      (B, C_out, T) in x.dtype.
    """
    B, C_in, T = x.shape
    C_out, _, K = weight.shape
    out_dtype = x.dtype
    if bias is None:
        bias = jnp.zeros((C_out,), dtype=jnp.float32)

    P = (K - 1) * dilation                          # causal left-context length
    halo_l = _round_up(P, 128) if P > 0 else 0      # lane-aligned halo width

    cdt = (jnp.dtype(compute_dtype) if compute_dtype is not None
           else jnp.dtype(x.dtype))
    in_b = cdt.itemsize
    out_b = jnp.dtype(out_dtype).itemsize
    c_in_sl = _round_up(C_in, 8)                    # sublane-padded rows (estimate)
    c_out_sl = _round_up(C_out, 8)

    budget, limit_cap = _vmem_budget()

    def _vmem_bytes(tt):
        x_buf = 2 * c_in_sl * tt * in_b             # double-buffered input tile
        o_buf = 2 * c_out_sl * tt * out_b           # double-buffered output tile
        w_buf = 2 * K * c_out_sl * _round_up(C_in, 128) * in_b   # (small, resident)
        b_buf = 2 * c_out_sl * 128 * 4
        win = c_in_sl * (halo_l + tt) * in_b        # carried halo window scratch
        live = (2 * c_in_sl * (halo_l + tt) + c_out_sl * tt) * 4  # vreg/spill slack
        return x_buf + o_buf + w_buf + b_buf + win + live

    # Largest lane-aligned time tile that fits the budget; clamp at >= 512 rows
    # (or the whole sequence if shorter) before shrinking further.
    TT = max(128, _round_up(min(time_tile, T), 128))
    floor = min(512, TT)
    while TT > floor and _vmem_bytes(TT) > budget:
        TT = max(floor, _round_up(TT // 2, 128))
    while TT > 128 and _vmem_bytes(TT) > budget:
        TT = max(128, _round_up(TT // 2, 128))
    TT = max(TT, halo_l)                            # keep the carry copy non-overlapping
    NT = -(-T // TT)
    T_p = NT * TT

    # Wrapper glue: cast to the MXU feed dtype and right-pad time to the tile
    # grid (trailing zeros never corrupt in-range outputs of a causal conv).
    x_c = x.astype(cdt)
    if T_p != T:
        x_c = jnp.pad(x_c, ((0, 0), (0, 0), (0, T_p - T)))
    w_r = jnp.transpose(weight, (2, 0, 1)).astype(cdt)        # (K, C_out, C_in)
    b_r = bias.astype(jnp.float32).reshape(C_out, 1)

    kernel = functools.partial(
        _causal_conv1d_kernel, kernel_size=K, dilation=dilation,
        causal_pad=P, halo_lanes=halo_l)

    scratch = []
    if P > 0:
        scratch.append(pltpu.VMEM((C_in, halo_l + TT), cdt))

    cost = pl.CostEstimate(
        flops=2 * B * T_p * K * C_in * C_out,
        transcendentals=0,
        bytes_accessed=(B * T_p * C_in * in_b + K * C_in * C_out * in_b
                        + C_out * 4 + B * T_p * C_out * out_b))

    vmem_limit = int(min(limit_cap,
                         max(32 * 2**20, _vmem_bytes(TT) + (8 << 20))))

    out = pl.pallas_call(
        kernel,
        out_shape=jax.ShapeDtypeStruct((B, C_out, T_p), out_dtype),
        grid=(B, NT),
        in_specs=[
            pl.BlockSpec((1, C_in, TT), lambda b, j: (b, 0, j)),
            pl.BlockSpec((K, C_out, C_in), lambda b, j: (0, 0, 0)),
            pl.BlockSpec((C_out, 1), lambda b, j: (0, 0)),
        ],
        out_specs=pl.BlockSpec((1, C_out, TT), lambda b, j: (b, 0, j)),
        scratch_shapes=scratch,
        compiler_params=pltpu.CompilerParams(
            # NOTE: time axis must stay sequential per core (carried halo).
            dimension_semantics=("parallel", "arbitrary"),
            vmem_limit_bytes=vmem_limit),
        cost_estimate=cost,
    )(x_c, w_r, b_r)

    return out[:, :, :T] if T_p != T else out


def _reference(x, weight, bias, dilation):
    """Pure-JAX reference mirroring PyTorch Conv1d(pad=(K-1)*d)[..., :-pad]."""
    K = weight.shape[-1]
    P = (K - 1) * dilation
    y = jax.lax.conv_general_dilated(
        x, weight,
        window_strides=(1,),
        padding=[(P, 0)],                   # causal: left pad only
        rhs_dilation=(dilation,),
        dimension_numbers=("NCH", "OIH", "NCH"),
    )
    return y + bias[None, :, None]


if __name__ == "__main__":
    key = jax.random.PRNGKey(0)
    kx, kw, kb = jax.random.split(key, 3)
    B, C_in, C_out = 2, 4, 8

    # 1) f32 path, strict tolerance, single time tile.
    T, K, d = 16, 3, 2
    x = jax.random.normal(kx, (B, C_in, T), dtype=jnp.float32)
    w = 0.1 * jax.random.normal(kw, (C_out, C_in, K), dtype=jnp.float32)
    b = 0.1 * jax.random.normal(kb, (C_out,), dtype=jnp.float32)
    y = jax.block_until_ready(causal_conv1d(x, w, b, d, compute_dtype=jnp.float32))
    assert y.shape == (B, C_out, T)
    assert jnp.allclose(y, _reference(x, w, b, d), atol=1e-5, rtol=1e-5), "mismatch (1)"

    # 2) several time tiles -> exercises the carried causal halo (f32 strict).
    T2, K2, d2 = 300, 3, 3
    x2 = jax.random.normal(kx, (B, C_in, T2), dtype=jnp.float32)
    w2 = 0.1 * jax.random.normal(kw, (C_out, C_in, K2), dtype=jnp.float32)
    b2 = 0.1 * jax.random.normal(kb, (C_out,), dtype=jnp.float32)
    y2 = jax.block_until_ready(
        causal_conv1d(x2, w2, b2, d2, time_tile=128, compute_dtype=jnp.float32))
    assert y2.shape == (B, C_out, T2)
    assert jnp.allclose(y2, _reference(x2, w2, b2, d2), atol=1e-5, rtol=1e-5), "mismatch (2)"

    # 3) large dilation (halo wider than the requested tile), f32 strict.
    T3, K3, d3 = 400, 2, 150
    x3 = jax.random.normal(kx, (B, C_in, T3), dtype=jnp.float32)
    w3 = 0.1 * jax.random.normal(kw, (C_out, C_in, K3), dtype=jnp.float32)
    b3 = 0.1 * jax.random.normal(kb, (C_out,), dtype=jnp.float32)
    y3 = jax.block_until_ready(
        causal_conv1d(x3, w3, b3, d3, time_tile=128, compute_dtype=jnp.float32))
    assert y3.shape == (B, C_out, T3)
    assert jnp.allclose(y3, _reference(x3, w3, b3, d3), atol=1e-5, rtol=1e-5), "mismatch (3)"

    # 4) default bf16 MXU feeds (f32 accumulation) -> relaxed tolerance.
    y4 = jax.block_until_ready(causal_conv1d(x2, w2, b2, d2))
    assert y4.shape == (B, C_out, T2)
    assert jnp.allclose(y4, _reference(x2, w2, b2, d2), atol=5e-2, rtol=5e-2), "mismatch (4)"

    print("KERNEL_OK")
</pallas_src>

<mosaic_0001>
module attributes {stable_mosaic.version = 11 : i64} {
  func.func @_causal_conv1d_kernel(%arg0: i32, %arg1: i32, %arg2: memref<1x4x128xf32, #tpu.memory_space<vmem>>, %arg3: memref<3x8x4xf32, #tpu.memory_space<vmem>>, %arg4: memref<8x1xf32, #tpu.memory_space<vmem>>, %arg5: memref<1x8x128xf32, #tpu.memory_space<vmem>>, %arg6: memref<4x256xf32, #tpu.memory_space<vmem>>) attributes {dimension_semantics = [#tpu.dimension_semantics<parallel>, #tpu.dimension_semantics<arbitrary>], iteration_bounds = array<i64: 2, 1>, scalar_prefetch = 0 : i64, scratch_operands = 1 : i64, tpu.core_type = #tpu.core_type<tc>, window_params = [{transform_indices = @transform_0, window_bounds = array<i64: 1, 4, 128>}, {pipeline_mode = #tpu.pipeline_mode<synchronous>, transform_indices = @transform_1, window_bounds = array<i64: 3, 8, 4>}, {pipeline_mode = #tpu.pipeline_mode<synchronous>, transform_indices = @transform_2, window_bounds = array<i64: 8, 1>}, {transform_indices = @transform_3, window_bounds = array<i64: 1, 8, 128>}]} {
    %c0 = arith.constant 0 : index
    %c0_0 = arith.constant 0 : index
    %c0_1 = arith.constant 0 : index
    %0 = vector.load %arg2[%c0, %c0_0, %c0_1] : memref<1x4x128xf32, #tpu.memory_space<vmem>>, vector<1x4x128xf32>
    %1 = vector.shape_cast %0 : vector<1x4x128xf32> to vector<4x128xf32>
    %c0_i32 = arith.constant 0 : i32
    %2 = arith.cmpi eq, %arg1, %c0_i32 : i32
    %3 = arith.extui %2 : i1 to i32
    %c0_i32_2 = arith.constant 0 : i32
    %4 = arith.cmpi ne, %3, %c0_i32_2 : i32
    scf.if %4 {
      %cst_24 = arith.constant 0.000000e+00 : f32
      %30 = vector.broadcast %cst_24 : f32 to vector<4x128xf32>
      %c0_25 = arith.constant 0 : index
      %c0_26 = arith.constant 0 : index
      %31 = vector.load %arg6[%c0_25, %c0_26] : memref<4x256xf32, #tpu.memory_space<vmem>>, vector<4x128xf32>
      tpu.vector_store %arg6[%c0_25, %c0_26], %30 {strides = array<i32>} : memref<4x256xf32, #tpu.memory_space<vmem>>, vector<4x128xf32>,
    } else {
    }
    %c0_3 = arith.constant 0 : index
    %c128 = arith.constant 128 : index
    %5 = vector.load %arg6[%c0_3, %c128] : memref<4x256xf32, #tpu.memory_space<vmem>>, vector<4x128xf32>
    tpu.vector_store %arg6[%c0_3, %c128], %1 {strides = array<i32>} : memref<4x256xf32, #tpu.memory_space<vmem>>, vector<4x128xf32>,
    %c0_4 = arith.constant 0 : index
    %c0_5 = arith.constant 0 : index
    %6 = vector.load %arg6[%c0_4, %c0_5] : memref<4x256xf32, #tpu.memory_space<vmem>>, vector<4x256xf32>
    %c132_i32 = arith.constant 132 : i32
    %7 = tpu.dynamic_rotate %6 by %c132_i32 dim 1 : vector<4x256xf32>, i32 -> vector<4x256xf32>
    %8 = vector.extract_strided_slice %7 {offsets = [0, 0], sizes = [4, 128], strides = [1, 1]} : vector<4x256xf32> to vector<4x128xf32>
    %c0_6 = arith.constant 0 : index
    %c0_7 = arith.constant 0 : index
    %c0_8 = arith.constant 0 : index
    %9 = vector.load %arg3[%c0_6, %c0_7, %c0_8] : memref<3x8x4xf32, #tpu.memory_space<vmem>>, vector<1x8x4xf32>
    %10 = vector.shape_cast %9 : vector<1x8x4xf32> to vector<8x4xf32>
    %cst = arith.constant dense<0.000000e+00> : vector<8x128xf32>
    %11 = tpu.matmul %10, %8, %cst {dimension_numbers = #tpu.dot_dimension_numbers<[1], [0], [0], [1], [0, 0, 1, 1], [], []>} : vector<8x4xf32>, vector<4x128xf32>, vector<8x128xf32> -> vector<8x128xf32>
    %c130_i32 = arith.constant 130 : i32
    %12 = tpu.dynamic_rotate %6 by %c130_i32 dim 1 : vector<4x256xf32>, i32 -> vector<4x256xf32>
    %13 = vector.extract_strided_slice %12 {offsets = [0, 0], sizes = [4, 128], strides = [1, 1]} : vector<4x256xf32> to vector<4x128xf32>
    %c1 = arith.constant 1 : index
    %c0_9 = arith.constant 0 : index
    %c0_10 = arith.constant 0 : index
    %14 = vector.load %arg3[%c1, %c0_9, %c0_10] : memref<3x8x4xf32, #tpu.memory_space<vmem>>, vector<1x8x4xf32>
    %15 = vector.shape_cast %14 : vector<1x8x4xf32> to vector<8x4xf32>
    %cst_11 = arith.constant dense<0.000000e+00> : vector<8x128xf32>
    %16 = tpu.matmul %15, %13, %cst_11 {dimension_numbers = #tpu.dot_dimension_numbers<[1], [0], [0], [1], [0, 0, 1, 1], [], []>} : vector<8x4xf32>, vector<4x128xf32>, vector<8x128xf32> -> vector<8x128xf32>
    %17 = arith.addf %11, %16 : vector<8x128xf32>
    %c2 = arith.constant 2 : index
    %c0_12 = arith.constant 0 : index
    %c0_13 = arith.constant 0 : index
    %18 = vector.load %arg3[%c2, %c0_12, %c0_13] : memref<3x8x4xf32, #tpu.memory_space<vmem>>, vector<1x8x4xf32>
    %19 = vector.shape_cast %18 : vector<1x8x4xf32> to vector<8x4xf32>
    %cst_14 = arith.constant dense<0.000000e+00> : vector<8x128xf32>
    %20 = tpu.matmul %19, %1, %cst_14 {dimension_numbers = #tpu.dot_dimension_numbers<[1], [0], [0], [1], [0, 0, 1, 1], [], []>} : vector<8x4xf32>, vector<4x128xf32>, vector<8x128xf32> -> vector<8x128xf32>
    %21 = arith.addf %17, %20 : vector<8x128xf32>
    %c0_15 = arith.constant 0 : index
    %c0_16 = arith.constant 0 : index
    %22 = vector.load %arg4[%c0_15, %c0_16] : memref<8x1xf32, #tpu.memory_space<vmem>>, vector<8x1xf32>
    %23 = vector.broadcast %22 : vector<8x1xf32> to vector<8x128xf32>
    %24 = arith.addf %21, %23 : vector<8x128xf32>
    %c0_17 = arith.constant 0 : index
    %c0_18 = arith.constant 0 : index
    %c0_19 = arith.constant 0 : index
    %25 = vector.load %arg5[%c0_17, %c0_18, %c0_19] : memref<1x8x128xf32, #tpu.memory_space<vmem>>, vector<1x8x128xf32>
    %26 = vector.shape_cast %25 : vector<1x8x128xf32> to vector<8x128xf32>
    %27 = vector.shape_cast %24 : vector<8x128xf32> to vector<1x8x128xf32>
    tpu.vector_store %arg5[%c0_17, %c0_18, %c0_19], %27 {strides = array<i32>} : memref<1x8x128xf32, #tpu.memory_space<vmem>>, vector<1x8x128xf32>,
    %c0_20 = arith.constant 0 : index
    %c128_21 = arith.constant 128 : index
    %28 = vector.load %arg6[%c0_20, %c128_21] : memref<4x256xf32, #tpu.memory_space<vmem>>, vector<4x128xf32>
    %c0_22 = arith.constant 0 : index
    %c0_23 = arith.constant 0 : index
    %29 = vector.load %arg6[%c0_22, %c0_23] : memref<4x256xf32, #tpu.memory_space<vmem>>, vector<4x128xf32>
    tpu.vector_store %arg6[%c0_22, %c0_23], %28 {strides = array<i32>} : memref<4x256xf32, #tpu.memory_space<vmem>>, vector<4x128xf32>,
    return
  }
  func.func @transform_0(%arg0: i32, %arg1: i32) -> (i32, i32, i32) {
    %c0_i32 = arith.constant 0 : i32
    %c0_i32_0 = arith.constant 0 : i32
    return %arg0, %c0_i32, %arg1 : i32, i32, i32
  }
  func.func @transform_1(%arg0: i32, %arg1: i32) -> (i32, i32, i32) {
    %c0_i32 = arith.constant 0 : i32
    %c0_i32_0 = arith.constant 0 : i32
    %c0_i32_1 = arith.constant 0 : i32
    %c0_i32_2 = arith.constant 0 : i32
    return %c0_i32, %c0_i32_0, %c0_i32_1 : i32, i32, i32
  }
  func.func @transform_2(%arg0: i32, %arg1: i32) -> (i32, i32) {
    %c0_i32 = arith.constant 0 : i32
    %c0_i32_0 = arith.constant 0 : i32
    %c0_i32_1 = arith.constant 0 : i32
    return %c0_i32, %c0_i32_0 : i32, i32
  }
  func.func @transform_3(%arg0: i32, %arg1: i32) -> (i32, i32, i32) {
    %c0_i32 = arith.constant 0 : i32
    %c0_i32_0 = arith.constant 0 : i32
    return %arg0, %c0_i32, %arg1 : i32, i32, i32
  }
}

</mosaic_0001>

<bundles_post_ra>
// kernel: tpu_custom_call.1
= control target key start
LH: loop header
LB: loop body
LE: loop exit
PB: predicated region body
PF: predicated region fallthrough
CT: control target
= control target key end

     0   :  { %8 = vsyncpa [#allocation4], 0  ;;  %s707_s0 = inlined_call_operand.vmem [shape: f32[2,4,128], index: 0, kind: input, shape index: {}]   ;;  %s708_s1 = inlined_call_operand.vmem [shape: f32[3,8,4], index: 1, kind: input, shape index: {}]   ;;  %s709_s2 = inlined_call_operand.vmem [shape: f32[8,1], index: 2, kind: input, shape index: {}]   ;;  %s710_s3 = inlined_call_operand.hbm [shape: f32[2,8,128], index: 3, kind: output, shape index: {}]  }
   0x1   :  { %10 = vsyncpa [#allocation4 + $0x1], 0  ;;  %s592_s12 = smov 0   ;;  %s594_s13 = smov 0  }
   0x2   :  { %s596_s14 = smov 0   ;;  %s598_s15 = smov 0  }
   0x3   :  { %s600_s16 = smov 0   ;;  %s602_s17 = smov 0  }
   0x4 LB: > { %s408_s18 = sadd.s32 4294967295, %s566_s17   ;;  %s409_s19 = sadd.s32 4294967294, %s566_s17   ;;  %s566_s17 = sphi %s602_s17, %s16_s17   ;;  %s562_s16 = sphi %s600_s16, %s717_s16   ;;  %s558_s15 = sphi %s598_s15, %s716_s15   ;;  %s554_s14 = sphi %s596_s14, %s715_s14   ;;  %s550_s13 = sphi %s594_s13, %s714_s13   ;;  %s546_s12 = sphi %s592_s12, %s713_s12  }
   0x5   : > { %s28_s20 = sadd.s32 1, %s562_s16  ;;  %s107_s21 = sadd.s32 1, %s554_s14 }
   0x6   : > { %p30_p0 = scmp.ge.s32.totalorder %s28_s20, 2  ;;  %p117_p1 = scmp.ne.s32.totalorder %s554_s14, %s550_s13 }
   0x7   : > { %p118_p2 = scmp.eq.s32.totalorder %s408_s18, 1  ;;  %p123_p3 = scmp.ne.s32.totalorder %s550_s13, %s546_s12 }
   0x8   : > { %s719_s20 = smov (%p30_p0, %s28_s20), 0  ;;  %p124_p5 = scmp.eq.s32.totalorder %s409_s19, 1 }
   0x9   : > { %p632_p4 = por %p118_p2, %p117_p1  ;;  %s102_s23 = ssub.s32 %s562_s16, %s719_s20 }
   0xa   : > { %p412_p6 = scmp.ge.s32.totalorder %s566_s17, 1  ;;  %p105_p7 = scmp.eq.s32.totalorder %s102_s23, 0 }
   0xb   : > { %p639_p8 = por %p124_p5, %p123_p3  ;;  %p158_p9 = scmp.lt.s32.totalorder %s566_s17, 3 }
   0xc   : > { %s645_s25 = scalar_select %p105_p7, %s554_s14, %s107_s21  }
   0xd   : > { %p159_p10 = pnand %p412_p6, %p158_p9 }
   0xe   : > { %p184_p11 = scmp.lt.s32.totalorder (!%p159_p10), %s558_s15, 1  ;;  %s569_s4 = smov (!%p159_p10), 4  }
   0xf   : > { %162 = sbr.rel (%p159_p10) target bundleno = 309 (0x135), region = 32  ;;  %s570_s5 = smov (!%p159_p10), 2  }
  0x10   : > { %s181_s21 = sand.u32 (!%p159_p10), 1, %s550_s13   ;;  %s508_s10 = scalar_lea.hbm (!%p159_p10), %s710_s3, 16 }
  0x11   : > { %s413_s23 = sshll.u32 (!%p159_p10), %s181_s21, 3  ;;  %s321_s6 = scalar_lea.sflag (!%p159_p10), [#allocation4], %s181_s21 }
  0x14   : > { %v568_v0 = vmov 0.0   ;;  %s185_s26 = scalar_select %p184_p11, %s558_s15, 1  ;;  %vm231_vm0 = vcmask 1043456   ;;  %vm227_vm1 = vcmask 31744   ;;  %v420_v8 = vld [vmem:[%s708_s1 + $0x10] sm:$0xff]  ;;  %v310_v9 = vld [vmem:[%s709_s2] sm:$0xff]  ;;  %v209_v11 = vlaneseq }
  0x15   : > { %196 = vst [vmem:[#allocation2] sm:$0xf] %v568_v0  ;;  %v571_v10 = vmov 0   ;;  %v213_v16 = vld [vmem:[%s708_s1] sm:$0xff]  ;;  %v415_v19 = vld [vmem:[%s708_s1 + $0x8] sm:$0xff] }
  0x16   : > { %s414_s27 = sshll.u32 %s185_s26, 2  ;;  %486 = vset.pattern.permute.xlu2 %v571_v10  ;;  %487 = vset.pattern.permute.xlu0 %v571_v10  ;;  %v210_v13 = vand.u32 127, %v209_v11  ;;  %s424_s26 = sshll.u32 %s558_s15, 3 }
  0x17   : > { %s190_s30 = scalar_lea.vmem %s707_s0, %s414_s27  ;;  %313 = vperm.xlu2 %486, %v310_v9   ;;  %s332_s29 = scalar_lea.hbm %s710_s3, %s424_s26 }
  0x18   : > { %v191_v1 = vld [vmem:[%s190_s30] sm:$0xf]  ;;  %vm211_vm2 = vcmp.lt.s32.totalorder %v210_v13, 4  ;;  %vm223_vm3 = vcmp.lt.s32.totalorder %v210_v13, 2  ;;  %s183_s30 = scalar_lea.vmem [#allocation3], %s413_s23 }
  0x19   : > { %197 = vst [vmem:[#allocation2 + $0x4] sm:$0xf] %v191_v1  ;;  %421 = vmatpush.msk.msra.mxu2 %vm231_vm0, %v191_v1 }
  0x1a   : > { %422 = vmatmul.msk.f32.vlgmr.msra.gmra.mxu2 %vm227_vm1, %v420_v8 }
  0x20   : > { %v198_v2 = vld [vmem:[#allocation2] sm:$0xff] }
  0x21   : > { %v318_v3 = vld [vmem:[#allocation2 + $0x4] sm:$0xf]  ;;  %200 = vst [vmem:[#allocation1] ss:$2 sm:$0xff] %v198_v2 }
  0x22   : > { %319 = vst [vmem:[#allocation2] sm:$0xf] %v318_v3 }
  0x28   : > { %v201_v4 = vld.sshfl [vmem:[#allocation1] sm:$0xff pattern:$0x75316420]  ;;  %v202_v5 = vld.sshfl [vmem:[#allocation1 + $0x8] sm:$0xff pattern:$0x75316420] }
  0x29   : > { %205 = vrot.lane.b32.xlu0 %v201_v4, %s569_s4  ;;  %214 = vst [vmem:[#allocation1] ss:$2 sm:$0xff] %v198_v2 }
  0x30   : > { %v215_v6 = vld.sshfl [vmem:[#allocation1] sm:$0xff pattern:$0x75316420]  ;;  %v216_v7 = vld.sshfl [vmem:[#allocation1 + $0x8] sm:$0xff pattern:$0x75316420] }
  0x31   : > { %207 = vrot.lane.b32.xlu0 %v202_v5, %s569_s4  ;;  %219 = vrot.lane.b32.xlu1 %v215_v6, %s570_s5  ;;  %s334_s4 = sshll.u32 %s183_s30, 4  ;;  %s335_s4 = int_to_ptr.vmem [resolvable:$true] %s334_s4 }
  0x39   : > { %221 = vrot.lane.b32.xlu1 %v216_v7, %s570_s5  ;;  %s336_s5 = sshll.u32 %s332_s29, 4  ;;  %s337_s5 = int_to_ptr.hbm [resolvable:$true] %s336_s5 }
  0x3a   : > { %s502_s15 = sshra.s32 %s337_s5, 4  ;;  %s503_s15 = int_to_ptr.hbm [resolvable:$true] %s502_s15 }
  0x3b   : > { %s504_s7 = scalar_lea.hbm %s503_s15, 8  ;;  %p509_p1 = scmp.lt.s32.totalorder %s503_s15, %s710_s3 }
  0x3c   : > { %p505_p12 = scmp.ne.s32.totalorder %s503_s15, %s504_s7  ;;  %p510_p2 = scmp.lt.s32.totalorder %s508_s10, %s504_s7 }
  0x3e   : > { %p506_p13 = pnand %p505_p12, %p632_p4  ;;  %p511_p3 = por %p510_p2, %p509_p1 }
  0x40   : > { %p507_p0 = pneg %p506_p13 }
  0x42   : > { %p512_p5 = pnand %p511_p3, %p507_p0 }
  0x71   : > { %v314_v25 = vpop.permute.xlu2 %313 }
  0x9b   : > { %v206_v12 = vpop.permute.xlu0 %205 }
  0x9d   : > { %v306_v23 = vpop.f32.mrf.mxu2 }
  0xa3   : > { %v208_v14 = vpop.permute.xlu0 %207  ;;  %v220_v15 = vpop.permute.xlu1 %219 }
  0xa4   : > { %v212_v17 = vsel %vm211_vm2, %v206_v12, %v208_v14 }
  0xa5   : > { %418 = vmatpush.msk.msra.mxu1 %vm231_vm0, %v212_v17 }
  0xa6   : > { %419 = vmatmul.msk.f32.vlgmr.msra.gmra.mxu1 %vm227_vm1, %v213_v16 }
  0xab   : > { %v222_v18 = vpop.permute.xlu1 %221 }
  0xac   : > { %v224_v20 = vsel %vm223_vm3, %v220_v15, %v222_v18 }
  0xad   : > { %416 = vmatpush.msk.msra.mxu0 %vm231_vm0, %v224_v20 }
  0xae   : > { %417 = vmatmul.msk.f32.vlgmr.msra.gmra.mxu0 %vm227_vm1, %v415_v19 }
 0x123   : > { %v278_v21 = vpop.f32.mrf.mxu1 }
 0x12b   : > { %v252_v22 = vpop.f32.mrf.mxu0 }
 0x12c   : > { %v279_v24 = vadd.f32 %v278_v21, %v252_v22 }
 0x12e   : > { %v309_v26 = vadd.f32 %v306_v23, %v279_v24 }
 0x130   : > { %v316_v27 = vadd.f32 %v314_v25, %v309_v26 }
 0x132   : > { %317 = vst [vmem:[%s183_s30] sm:$0xff] %v316_v27 }
 0x133   : > { %515 = shalt.err (!%p512_p5)
}
 0x134   : > { %427 = dma.vmem_to_hbm [thread:$0]  (%p632_p4), %s335_s4, 128, %s337_s5, %s321_s6  }
 0x135 PF: > { %p433_p6 = scmp.ge.s32.totalorder %s566_s17, 2  ;;  %s348_s19 = sand.u32 1, %s546_s12  }
 0x136   : > { %s349_s21 = scalar_lea.sflag [#allocation4], %s348_s19 }
 0x137   : > { %p430_p7 = pnand %p433_p6, %p639_p8 }
 0x139   : > { %p431_p9 = pneg %p430_p7 }
 0x13b   : > { %541 = dma.done.wait (%p431_p9), %s349_s21, 128  }
 0x13c   : > { %543 = vsyncadd (%p431_p9), %s349_s21, 4294967168  ;;  %s16_s17 = sadd.s32 1, %s566_s17   ;;  %s713_s12 = smov %s550_s13 }
 0x13d   : > { %p13_p10 = scmp.ge.s32.totalorder %s16_s17, 4   ;;  %s714_s13 = smov %s554_s14 }
 0x13e   : > { %s715_s14 = smov %s645_s25  ;;  %s716_s15 = smov %s562_s16 }
 0x13f   : > { %s717_s16 = smov %s719_s20  ;;  %15 = sbr.rel (!%p13_p10) target bundleno = 4 (0x4), region = 73 }
 0x144   :  { %355 = vsyncpa [#allocation4], 1 }
 0x145   :  { %357 = vsyncpa [#allocation4 + $0x1], 1 }

</bundles_post_ra>
